<compile_context>
chip_gen: v6e
topology: v6e:2x2x1
jax: 0.10.0
libtpu: 0.0.40
codegen_flags: <defaults>
</compile_context>

<pallas_src>
import jax
import jax.numpy as jnp
from jax.experimental import pallas as pl
from jax.experimental.pallas import tpu as pltpu


# ----------------------------- weight preprocessing -----------------------------

def _round_up(x, m):
    return ((x + m - 1) // m) * m


def _conv1_band_weights(w1, W):
    """Conv2d(3x3, pad=1) weights -> 3 banded GEMM matrices (one per row tap ky).

    M_ky[(w+kx)*Cin + ci, w*Cmid + co] = w1[co, ci, ky, kx], so that
      y1 = relu( sum_ky xpad[ky:ky+H, :] @ M_ky + b1_row )
    with xpad the zero-padded input in (H+2, (W+2)*Cin) channels-fastest layout.
    """
    Cmid, Cin = w1.shape[0], w1.shape[1]
    eye = jnp.eye(W, dtype=w1.dtype)
    mats = []
    for ky in range(3):
        m = jnp.zeros(((W + 2) * Cin, W * Cmid), w1.dtype)
        for kx in range(3):
            blk = jnp.transpose(w1[:, :, ky, kx])              # (Cin, Cmid)
            band = jnp.kron(eye, blk)                          # (W*Cin, W*Cmid)
            m = m + jnp.pad(band, ((kx * Cin, (2 - kx) * Cin), (0, 0)))
        mats.append(m)
    return jnp.stack(mats, axis=0)                             # (3, (W+2)*Cin, W*Cmid)


def _convt_phase_weights(wt, W):
    """ConvTranspose2d(3x3, s=2, p=1, op=1) -> 2 phase GEMM matrices (row taps ty).

    4-phase / sub-pixel decomposition: output pixel (2m+dy, 2n+dx, co) equals
      sum_{ty,tx,c} y1[m+ty, n+tx, c] * wt[c, co, dy+1-2ty, dx+1-2tx]
    (terms whose kernel index falls outside [0,3) vanish).  Columns are ordered
    (dy, 2n+dx, co) so the output is lane dense.  Rows referencing y1 column W
    (the zero column halo) are kept here and truncated by the caller.
    """
    Cmid, Cout = wt.shape[0], wt.shape[1]
    eye = jnp.eye(W, dtype=wt.dtype)
    half = 2 * W * Cout
    mats = []
    for ty in range(2):
        q = jnp.zeros(((W + 1) * Cmid, 2 * half), wt.dtype)
        for tx in range(2):
            for dy in range(2):
                ky = dy + 1 - 2 * ty
                if not 0 <= ky < 3:
                    continue
                for dx in range(2):
                    kx = dx + 1 - 2 * tx
                    if not 0 <= kx < 3:
                        continue
                    blk = wt[:, :, ky, kx]                                      # (Cmid, Cout)
                    blk = jnp.pad(blk, ((0, 0), (dx * Cout, (1 - dx) * Cout)))  # (Cmid, 2*Cout)
                    band = jnp.kron(eye, blk)                                   # (W*Cmid, 2W*Cout)
                    q = q + jnp.pad(band, ((tx * Cmid, (1 - tx) * Cmid),
                                           (dy * half, (1 - dy) * half)))
        mats.append(q)
    return jnp.stack(mats, axis=0)                             # (2, (W+1)*Cmid, 4*W*Cout)


def prepare_decoder_params(params, *, width):
    """One-time (parameter-load-time) preprocessing: banded / phase weights
    stacked along K, lane-padded, cast to bf16; biases tiled to output rows."""
    w1, b1, wt, bt = params["w1"], params["b1"], params["wt"], params["bt"]
    Cin, Cmid, Cout = w1.shape[1], w1.shape[0], wt.shape[1]
    W = width
    kin = (W + 2) * Cin
    kin_pad = _round_up(kin, 128)                 # lane-aligned per-tap K chunk
    n_mid, n_out = W * Cmid, 4 * W * Cout

    w1b = _conv1_band_weights(w1, W)                               # (3, kin, n_mid)
    w1b = jnp.pad(w1b, ((0, 0), (0, kin_pad - kin), (0, 0)))       # zero rows for lane pad
    w1b = w1b.reshape(3 * kin_pad, n_mid).astype(jnp.bfloat16)     # K-stacked

    qb = _convt_phase_weights(wt, W)                               # (2, (W+1)*Cmid, n_out)
    qb = qb[:, :n_mid, :]                    # drop column-halo rows (multiply zeros only)
    qb = qb.reshape(2 * n_mid, n_out).astype(jnp.bfloat16)         # K-stacked

    b1row = jnp.tile(b1, W).reshape(1, n_mid).astype(jnp.float32)
    b2row = jnp.tile(bt, 4 * W).reshape(1, n_out).astype(jnp.float32)
    return dict(w1=w1b, b1=b1row, q=qb, b2=b2row)


# ----------------------------------- kernel -----------------------------------

def _decoder_block_kernel(xp_ref, w1_ref, b1_ref, q_ref, b2_ref, o_ref, y1_scr):
    """Fused ConvRelu + 4-phase ConvTranspose + ReLU for B_TILE images.

    xp_ref : (B, H+2, KINP)        zero-padded bf16 input, channels-fastest rows,
                                   lane-padded to KINP (multiple of 128)
    w1_ref : (3*KINP, W*Cmid)      K-stacked banded conv1 weights (bf16)
    b1_ref : (1, W*Cmid)           f32
    q_ref  : (2*W*Cmid, 4*W*Cout)  K-stacked conv-transpose phase weights (bf16)
    b2_ref : (1, 4*W*Cout)         f32
    o_ref  : (B, H, 4*W*Cout)      bf16, columns ordered (dy, 2n+dx, co)
    y1_scr : (B, H+1, W*Cmid)      bf16 VMEM scratch (y1 + zero halo row / image)
    """
    bt, H, n_out = o_ref.shape
    kinp = xp_ref.shape[2]
    n_mid = y1_scr.shape[2]

    # --- stage 1: 3x3 conv + bias + ReLU as ONE K-stacked GEMM over row taps ---
    # ref slices (shifted VMEM loads), lane-aligned concat at multiples of 128.
    lhs1 = jnp.concatenate(
        [xp_ref[:, 0:H, :], xp_ref[:, 1:H + 1, :], xp_ref[:, 2:H + 2, :]],
        axis=-1).reshape(bt * H, 3 * kinp)                          # (M, 3*KINP) bf16
    acc1 = jnp.dot(lhs1, w1_ref[...], preferred_element_type=jnp.float32)
    y1 = jnp.maximum(acc1 + b1_ref[...], 0.0).astype(jnp.bfloat16)  # (M, n_mid)

    # y1 never leaves VMEM: store once (bf16) and keep a 1-row zero halo per
    # image for the ty=1 tap.  Halo is re-zeroed EVERY step (megacore-safe).
    y1_scr[:, 0:H, :] = y1.reshape(bt, H, n_mid)
    y1_scr[:, H:H + 1, :] = jnp.zeros((bt, 1, n_mid), jnp.bfloat16)

    # --- stage 2: ConvTranspose (4 phases) + bias + ReLU as ONE K-stacked GEMM ---
    # tap ty=0 is y1 itself (reuse the value), tap ty=1 is the ref-sliced
    # row-shifted copy whose last row is the zero halo.
    lhs2 = jnp.concatenate(
        [y1.reshape(bt, H, n_mid), y1_scr[:, 1:H + 1, :]],
        axis=-1).reshape(bt * H, 2 * n_mid)                         # (M, 2*n_mid) bf16
    acc2 = jnp.dot(lhs2, q_ref[...], preferred_element_type=jnp.float32)
    out = jnp.maximum(acc2 + b2_ref[...], 0.0)
    o_ref[...] = out.reshape(bt, H, n_out).astype(o_ref.dtype)


# ---------------------------------- wrapper ------------------------------------

def _pick_batch_tile(n, h):
    """Largest divisor of n with tile*h <= 128 (fills MXU rows, v5e-friendly)."""
    cap = max(1, 128 // max(h, 1))
    tile = max(1, min(n, cap))
    while n % tile:
        tile -= 1
    return tile


def decoder_block_forward(x_nchw, prepped, *, batch_tile=None):
    N, Cin, H, W = x_nchw.shape
    w1p, b1p, qp, b2p = prepped["w1"], prepped["b1"], prepped["q"], prepped["b2"]
    kin_pad = w1p.shape[0] // 3
    n_mid = w1p.shape[1]
    n_out = b2p.shape[1]
    Cout = n_out // (4 * W)

    btile = batch_tile if batch_tile is not None else _pick_batch_tile(N, H)
    assert N % btile == 0, (N, btile)
    # NOTE(v7x): for best megacore use pick btile so (N // btile) is even.

    # NCHW -> NHWC, spatial zero-pad, flatten (w, c) channels-fastest per row,
    # lane-pad each row to kin_pad and cast to bf16 (halves the input DMA).
    x = jnp.transpose(x_nchw, (0, 2, 3, 1))
    xp = jnp.pad(x, ((0, 0), (1, 1), (1, 1), (0, 0))).reshape(N, H + 2, (W + 2) * Cin)
    xp = jnp.pad(xp, ((0, 0), (0, 0), (0, kin_pad - (W + 2) * Cin))).astype(jnp.bfloat16)

    out = pl.pallas_call(
        _decoder_block_kernel,
        out_shape=jax.ShapeDtypeStruct((N, H, n_out), jnp.bfloat16),
        grid_spec=pltpu.PrefetchScalarGridSpec(
            num_scalar_prefetch=0,
            grid=(N // btile,),                 # B_TILE images per step -> M = btile*H
            in_specs=[
                pl.BlockSpec((btile, H + 2, kin_pad), lambda n: (n, 0, 0)),
                pl.BlockSpec((3 * kin_pad, n_mid), lambda n: (0, 0)),
                pl.BlockSpec((1, n_mid), lambda n: (0, 0)),
                pl.BlockSpec((2 * n_mid, n_out), lambda n: (0, 0)),
                pl.BlockSpec((1, n_out), lambda n: (0, 0)),
            ],
            out_specs=pl.BlockSpec((btile, H, n_out), lambda n: (n, 0, 0)),
            scratch_shapes=[pltpu.VMEM((btile, H + 1, n_mid), jnp.bfloat16)],
        ),
        compiler_params=pltpu.CompilerParams(dimension_semantics=("parallel",)),
    )(xp, w1p, b1p, qp, b2p)

    # out[n, m, dy*2W*Cout + q*Cout + co] == y2_nhwc[n, 2m+dy, q, co]; a row-major
    # reshape interleaves (m, dy) -> 2m+dy and splits columns into (2W, Cout).
    y2 = out.reshape(N, 2 * H, 2 * W, Cout)
    # NOTE: the NHWC->NCHW transpose (+ f32 upcast) is a separate XLA HBM round
    # trip kept only for PyTorch-layout parity; keep NHWC/bf16 if the consumer allows.
    return jnp.transpose(y2, (0, 3, 1, 2)).astype(jnp.float32)


# -------------------------- pure-XLA reference (check) --------------------------

def _reference_forward(x_nchw, params):
    w1, b1, wt, bt = params["w1"], params["b1"], params["wt"], params["bt"]
    dn = ("NCHW", "OIHW", "NCHW")
    y1 = jax.lax.conv_general_dilated(x_nchw, w1, (1, 1), ((1, 1), (1, 1)),
                                      dimension_numbers=dn)
    y1 = jnp.maximum(y1 + b1[None, :, None, None], 0.0)
    # ConvTranspose2d(k=3, s=2, p=1, op=1) == dilated conv with flipped/swapped weights.
    w_eq = jnp.transpose(wt, (1, 0, 2, 3))[:, :, ::-1, ::-1]
    y2 = jax.lax.conv_general_dilated(y1, w_eq, (1, 1), ((1, 2), (1, 2)),
                                      lhs_dilation=(2, 2), dimension_numbers=dn)
    return jnp.maximum(y2 + bt[None, :, None, None], 0.0)


if __name__ == "__main__":
    key = jax.random.PRNGKey(0)
    N, Cin, H, W = 8, 4, 16, 16          # N=8 -> B_TILE=8, M = 128, grid=(1,)
    Cmid, Cout = 8, 4
    k = jax.random.split(key, 5)

    x = jax.random.normal(k[0], (N, Cin, H, W), jnp.float32)

    # Deterministic PyTorch-style uniform(-1/sqrt(fan_in), 1/sqrt(fan_in)) init.
    fan1 = Cin * 3 * 3
    w1 = jax.random.uniform(k[1], (Cmid, Cin, 3, 3), jnp.float32, -1.0, 1.0) / jnp.sqrt(fan1)
    b1 = jax.random.uniform(k[2], (Cmid,), jnp.float32, -1.0, 1.0) / jnp.sqrt(fan1)
    fant = Cmid * 3 * 3
    wt = jax.random.uniform(k[3], (Cmid, Cout, 3, 3), jnp.float32, -1.0, 1.0) / jnp.sqrt(fant)
    bt = jax.random.uniform(k[4], (Cout,), jnp.float32, -1.0, 1.0) / jnp.sqrt(fant)
    params = dict(w1=w1, b1=b1, wt=wt, bt=bt)

    prepped = prepare_decoder_params(params, width=W)   # once, at parameter-load time
    fwd = jax.jit(decoder_block_forward)

    out = jax.block_until_ready(fwd(x, prepped))
    assert out.shape == (N, Cout, 2 * H, 2 * W), out.shape
    assert bool(jnp.all(out >= 0.0))                    # final ReLU

    ref = _reference_forward(x, params)
    scale = float(jnp.max(jnp.abs(ref)))
    err = float(jnp.max(jnp.abs(out - ref)))
    # bf16 MXU inputs/weights + bf16 output, f32 accumulation -> scale-relative check.
    assert err <= 5e-2 * max(1.0, scale), (err, scale)

    # Small-batch path (batch=2 -> B_TILE=2), same prepared weights.
    out2 = jax.block_until_ready(fwd(x[:2], prepped))
    assert out2.shape == (2, Cout, 2 * H, 2 * W), out2.shape
    err2 = float(jnp.max(jnp.abs(out2 - ref[:2])))
    assert err2 <= 5e-2 * max(1.0, scale), (err2, scale)

    print("KERNEL_OK")
</pallas_src>

<mosaic_0001>
module attributes {stable_mosaic.version = 11 : i64} {
  func.func @_decoder_block_kernel(%arg0: i32, %arg1: memref<8x18x128xbf16, #tpu.memory_space<vmem>>, %arg2: memref<384x128xbf16, #tpu.memory_space<vmem>>, %arg3: memref<1x128xf32, #tpu.memory_space<vmem>>, %arg4: memref<256x256xbf16, #tpu.memory_space<vmem>>, %arg5: memref<1x256xf32, #tpu.memory_space<vmem>>, %arg6: memref<8x16x256xbf16, #tpu.memory_space<vmem>>, %arg7: memref<8x17x128xbf16, #tpu.memory_space<vmem>>) attributes {dimension_semantics = [#tpu.dimension_semantics<parallel>], iteration_bounds = array<i64: 1>, scalar_prefetch = 0 : i64, scratch_operands = 1 : i64, tpu.core_type = #tpu.core_type<tc>, window_params = [{transform_indices = @transform_0, window_bounds = array<i64: 8, 18, 128>}, {pipeline_mode = #tpu.pipeline_mode<synchronous>, transform_indices = @transform_1, window_bounds = array<i64: 384, 128>}, {pipeline_mode = #tpu.pipeline_mode<synchronous>, transform_indices = @transform_2, window_bounds = array<i64: 1, 128>}, {pipeline_mode = #tpu.pipeline_mode<synchronous>, transform_indices = @transform_3, window_bounds = array<i64: 256, 256>}, {pipeline_mode = #tpu.pipeline_mode<synchronous>, transform_indices = @transform_4, window_bounds = array<i64: 1, 256>}, {transform_indices = @transform_5, window_bounds = array<i64: 8, 16, 256>}]} {
    %c0 = arith.constant 0 : index
    %c0_0 = arith.constant 0 : index
    %c0_1 = arith.constant 0 : index
    %0 = vector.load %arg1[%c0, %c0_0, %c0_1] : memref<8x18x128xbf16, #tpu.memory_space<vmem>>, vector<8x16x128xbf16>
    %c0_2 = arith.constant 0 : index
    %c1 = arith.constant 1 : index
    %c0_3 = arith.constant 0 : index
    %1 = vector.load %arg1[%c0_2, %c1, %c0_3] : memref<8x18x128xbf16, #tpu.memory_space<vmem>>, vector<8x16x128xbf16>
    %c0_4 = arith.constant 0 : index
    %c2 = arith.constant 2 : index
    %c0_5 = arith.constant 0 : index
    %2 = vector.load %arg1[%c0_4, %c2, %c0_5] : memref<8x18x128xbf16, #tpu.memory_space<vmem>>, vector<8x16x128xbf16>
    %3 = tpu.concatenate %0, %1, %2 in 2 : vector<8x16x128xbf16>, vector<8x16x128xbf16>, vector<8x16x128xbf16> -> vector<8x16x384xbf16>
    %4 = vector.shape_cast %3 : vector<8x16x384xbf16> to vector<128x384xbf16>
    %c0_6 = arith.constant 0 : index
    %c0_7 = arith.constant 0 : index
    %5 = vector.load %arg2[%c0_6, %c0_7] : memref<384x128xbf16, #tpu.memory_space<vmem>>, vector<384x128xbf16>
    %cst = arith.constant dense<0.000000e+00> : vector<128x128xf32>
    %6 = tpu.matmul %4, %5, %cst {dimension_numbers = #tpu.dot_dimension_numbers<[1], [0], [0], [1], [0, 0, 1, 1], [], []>} : vector<128x384xbf16>, vector<384x128xbf16>, vector<128x128xf32> -> vector<128x128xf32>
    %c0_8 = arith.constant 0 : index
    %c0_9 = arith.constant 0 : index
    %7 = vector.load %arg3[%c0_8, %c0_9] : memref<1x128xf32, #tpu.memory_space<vmem>>, vector<1x128xf32>
    %8 = vector.broadcast %7 : vector<1x128xf32> to vector<128x128xf32>
    %9 = arith.addf %6, %8 : vector<128x128xf32>
    %cst_10 = arith.constant 0.000000e+00 : f32
    %10 = vector.broadcast %cst_10 : f32 to vector<128x128xf32>
    %11 = arith.maximumf %9, %10 : vector<128x128xf32>
    %12 = arith.truncf %11 : vector<128x128xf32> to vector<128x128xbf16>
    %13 = vector.shape_cast %12 : vector<128x128xbf16> to vector<8x16x128xbf16>
    %c0_11 = arith.constant 0 : index
    %c0_12 = arith.constant 0 : index
    %c0_13 = arith.constant 0 : index
    %14 = vector.load %arg7[%c0_11, %c0_12, %c0_13] : memref<8x17x128xbf16, #tpu.memory_space<vmem>>, vector<8x16x128xbf16>
    tpu.vector_store %arg7[%c0_11, %c0_12, %c0_13], %13 {strides = array<i32>} : memref<8x17x128xbf16, #tpu.memory_space<vmem>>, vector<8x16x128xbf16>,
    %cst_14 = arith.constant 0.000000e+00 : bf16
    %15 = vector.broadcast %cst_14 : bf16 to vector<8x1x128xbf16>
    %c0_15 = arith.constant 0 : index
    %c16 = arith.constant 16 : index
    %c0_16 = arith.constant 0 : index
    %16 = vector.load %arg7[%c0_15, %c16, %c0_16] : memref<8x17x128xbf16, #tpu.memory_space<vmem>>, vector<8x1x128xbf16>
    tpu.vector_store %arg7[%c0_15, %c16, %c0_16], %15 {strides = array<i32>} : memref<8x17x128xbf16, #tpu.memory_space<vmem>>, vector<8x1x128xbf16>,
    %17 = vector.shape_cast %12 : vector<128x128xbf16> to vector<8x16x128xbf16>
    %c0_17 = arith.constant 0 : index
    %c1_18 = arith.constant 1 : index
    %c0_19 = arith.constant 0 : index
    %18 = vector.load %arg7[%c0_17, %c1_18, %c0_19] : memref<8x17x128xbf16, #tpu.memory_space<vmem>>, vector<8x16x128xbf16>
    %19 = tpu.concatenate %17, %18 in 2 : vector<8x16x128xbf16>, vector<8x16x128xbf16> -> vector<8x16x256xbf16>
    %20 = vector.shape_cast %19 : vector<8x16x256xbf16> to vector<128x256xbf16>
    %c0_20 = arith.constant 0 : index
    %c0_21 = arith.constant 0 : index
    %21 = vector.load %arg4[%c0_20, %c0_21] : memref<256x256xbf16, #tpu.memory_space<vmem>>, vector<256x256xbf16>
    %cst_22 = arith.constant dense<0.000000e+00> : vector<128x256xf32>
    %22 = tpu.matmul %20, %21, %cst_22 {dimension_numbers = #tpu.dot_dimension_numbers<[1], [0], [0], [1], [0, 0, 1, 1], [], []>} : vector<128x256xbf16>, vector<256x256xbf16>, vector<128x256xf32> -> vector<128x256xf32>
    %c0_23 = arith.constant 0 : index
    %c0_24 = arith.constant 0 : index
    %23 = vector.load %arg5[%c0_23, %c0_24] : memref<1x256xf32, #tpu.memory_space<vmem>>, vector<1x256xf32>
    %24 = vector.broadcast %23 : vector<1x256xf32> to vector<128x256xf32>
    %25 = arith.addf %22, %24 : vector<128x256xf32>
    %cst_25 = arith.constant 0.000000e+00 : f32
    %26 = vector.broadcast %cst_25 : f32 to vector<128x256xf32>
    %27 = arith.maximumf %25, %26 : vector<128x256xf32>
    %28 = vector.shape_cast %27 : vector<128x256xf32> to vector<8x16x256xf32>
    %29 = arith.truncf %28 : vector<8x16x256xf32> to vector<8x16x256xbf16>
    %c0_26 = arith.constant 0 : index
    %c0_27 = arith.constant 0 : index
    %c0_28 = arith.constant 0 : index
    %30 = vector.load %arg6[%c0_26, %c0_27, %c0_28] : memref<8x16x256xbf16, #tpu.memory_space<vmem>>, vector<8x16x256xbf16>
    tpu.vector_store %arg6[%c0_26, %c0_27, %c0_28], %29 {strides = array<i32>} : memref<8x16x256xbf16, #tpu.memory_space<vmem>>, vector<8x16x256xbf16>,
    return
  }
  func.func @transform_0(%arg0: i32) -> (i32, i32, i32) {
    %c0_i32 = arith.constant 0 : i32
    %c0_i32_0 = arith.constant 0 : i32
    %c0_i32_1 = arith.constant 0 : i32
    return %arg0, %c0_i32, %c0_i32_0 : i32, i32, i32
  }
  func.func @transform_1(%arg0: i32) -> (i32, i32) {
    %c0_i32 = arith.constant 0 : i32
    %c0_i32_0 = arith.constant 0 : i32
    %c0_i32_1 = arith.constant 0 : i32
    return %c0_i32, %c0_i32_0 : i32, i32
  }
  func.func @transform_2(%arg0: i32) -> (i32, i32) {
    %c0_i32 = arith.constant 0 : i32
    %c0_i32_0 = arith.constant 0 : i32
    %c0_i32_1 = arith.constant 0 : i32
    return %c0_i32, %c0_i32_0 : i32, i32
  }
  func.func @transform_3(%arg0: i32) -> (i32, i32) {
    %c0_i32 = arith.constant 0 : i32
    %c0_i32_0 = arith.constant 0 : i32
    %c0_i32_1 = arith.constant 0 : i32
    return %c0_i32, %c0_i32_0 : i32, i32
  }
  func.func @transform_4(%arg0: i32) -> (i32, i32) {
    %c0_i32 = arith.constant 0 : i32
    %c0_i32_0 = arith.constant 0 : i32
    %c0_i32_1 = arith.constant 0 : i32
    return %c0_i32, %c0_i32_0 : i32, i32
  }
  func.func @transform_5(%arg0: i32) -> (i32, i32, i32) {
    %c0_i32 = arith.constant 0 : i32
    %c0_i32_0 = arith.constant 0 : i32
    %c0_i32_1 = arith.constant 0 : i32
    return %arg0, %c0_i32, %c0_i32_0 : i32, i32, i32
  }
}

</mosaic_0001>

<bundles_post_ra>
// kernel: decoder_block_forward.1
= control target key start
LH: loop header
LB: loop body
LE: loop exit
PB: predicated region body
PF: predicated region fallthrough
CT: control target
= control target key end

     0   :  { %10 = vsyncpa [#allocation4], 0  ;;  %s2454_s0 = inlined_call_operand.vmem [shape: bf16[8,18,128], index: 0, kind: input, shape index: {}]   ;;  %s2455_s1 = inlined_call_operand.hbm [shape: bf16[384,128], index: 1, kind: input, shape index: {}]   ;;  %s2456_s2 = inlined_call_operand.hbm [shape: f32[1,128], index: 2, kind: input, shape index: {}]   ;;  %s2457_s3 = inlined_call_operand.hbm [shape: bf16[256,256], index: 3, kind: input, shape index: {}]   ;;  %s2458_s4 = inlined_call_operand.hbm [shape: f32[1,256], index: 4, kind: input, shape index: {}]   ;;  %s2459_s5 = inlined_call_operand.vmem [shape: bf16[8,16,256], index: 5, kind: output, shape index: {}]  }
   0x1   :  { %11 = vsyncpa [#allocation6], 0 }
   0x2   :  { %12 = vsyncpa [#allocation9], 0  ;;  %s2016_s18 = smov [#allocation5]   ;;  %s2017_s20 = smov [#allocation3]  }
   0x3   :  { %s33_s19 = sshll.u32 %s2016_s18, 4  ;;  %s20_s21 = sshll.u32 %s2017_s20, 4  ;;  %s34_s19 = int_to_ptr.vmem [resolvable:$true] %s33_s19  ;;  %s21_s21 = int_to_ptr.vmem [resolvable:$true] %s20_s21 }
   0x4   :  { %s1938_s22 = scalar_lea.vmem %s34_s19, 16  ;;  %s1942_s23 = scalar_lea.vmem %s34_s19, 32 }
   0x5   :  { %p1939_p0 = scmp.ne.s32.totalorder %s34_s19, %s1938_s22  ;;  %p1943_p1 = scmp.lt.s32.totalorder %s34_s19, %s34_s19 }
   0x6   :  { %p1944_p2 = scmp.lt.s32.totalorder %s1942_s23, %s1938_s22 }
   0x8   :  { %p1945_p3 = por %p1944_p2, %p1943_p1 }
   0xa   :  { %p1946_p4 = pnand %p1945_p3, %p1939_p0 }
   0xc   :  { %1949 = shalt.err (!%p1946_p4)
}
   0xd   :  { %36 = dma.hbm_to_vmem [thread:$0]  %s2456_s2, 16, %s34_s19, [#allocation6]  }
   0xe   :  { %s1958_s26 = scalar_lea.vmem %s21_s21, 3072  ;;  %p1963_p6 = scmp.lt.s32.totalorder %s21_s21, %s21_s21 }
   0xf   :  { %p1959_p5 = scmp.ne.s32.totalorder %s21_s21, %s1958_s26  ;;  %p1964_p7 = scmp.lt.s32.totalorder %s1958_s26, %s1958_s26 }
  0x11   :  { %p1965_p8 = por %p1964_p7, %p1963_p6 }
  0x13   :  { %p1966_p9 = pnand %p1965_p8, %p1959_p5 }
  0x15   :  { %1969 = shalt.err (!%p1966_p9)
}
  0x16   :  { %s2018_s27 = smov 64   ;;  %s2019_s28 = smov 4  }
  0x17   :  { %26 = dma.hbm_to_vmem [thread:$0]  %s2455_s1, 3072, %s21_s21, [#allocation4], %s2018_s27, %s2018_s27, %s2019_s28  }
  0x18   :  { %s2020_s6 = smov [#allocation7]  }
  0x19   :  { %s42_s7 = sshll.u32 %s2020_s6, 4  ;;  %s43_s7 = int_to_ptr.vmem [resolvable:$true] %s42_s7 }
  0x1a   :  { %s1978_s8 = scalar_lea.vmem %s43_s7, 4096  ;;  %p1983_p11 = scmp.lt.s32.totalorder %s43_s7, %s43_s7 }
  0x1b   :  { %p1979_p10 = scmp.ne.s32.totalorder %s43_s7, %s1978_s8  ;;  %p1984_p12 = scmp.lt.s32.totalorder %s1978_s8, %s1978_s8 }
  0x1d   :  { %p1985_p13 = por %p1984_p12, %p1983_p11 }
  0x1f   :  { %p1986_p0 = pnand %p1985_p13, %p1979_p10 }
  0x21   :  { %1989 = shalt.err (!%p1986_p0)
}
  0x22   :  { %s2021_s2 = smov 128   ;;  %s2022_s9 = smov 8  }
  0x23   :  { %48 = dma.hbm_to_vmem [thread:$0]  %s2457_s3, 4096, %s43_s7, [#allocation6], %s2021_s2, %s2021_s2, %s2022_s9  }
  0x24   :  { %s2023_s12 = smov [#allocation8]  }
  0x25   :  { %s55_s13 = sshll.u32 %s2023_s12, 4  ;;  %s56_s13 = int_to_ptr.vmem [resolvable:$true] %s55_s13 }
  0x26   :  { %s1998_s1 = scalar_lea.vmem %s56_s13, 32  ;;  %p2003_p2 = scmp.lt.s32.totalorder %s56_s13, %s56_s13 }
  0x27   :  { %p1999_p1 = scmp.ne.s32.totalorder %s56_s13, %s1998_s1  ;;  %p2004_p3 = scmp.lt.s32.totalorder %s1998_s1, %s1998_s1 }
  0x29   :  { %p2005_p4 = por %p2004_p3, %p2003_p2 }
  0x2b   :  { %p2006_p5 = pnand %p2005_p4, %p1999_p1 }
  0x2d   :  { %2009 = shalt.err (!%p2006_p5)
}
  0x2e   :  { %58 = dma.hbm_to_vmem [thread:$0]  %s2458_s4, 32, %s56_s13, [#allocation9]  }
  0x2f   :  { %2010 = dma.done.wait [#allocation4], 3072  }
  0x30   :  { %2011 = vsyncadd [#allocation4], 4294964224 }
  0x31   :  { %2012 = dma.done.wait [#allocation6], 4112  }
  0x32   :  { %2013 = vsyncadd [#allocation6], 4294963184 }
  0x33   :  { %2014 = dma.done.wait [#allocation9], 32  }
  0x34   :  { %2015 = vsyncadd [#allocation9], 4294967264  ;;  %v1818_v0 = vld [vmem:[#allocation3 + $0x78] sm:$0xff]   ;;  %v1820_v2 = vld [vmem:[#allocation3 + $0x70] sm:$0xff]   ;;  %vm176_vm0 = vsmask.f32 7424 }
  0x35   :  { %v1819_v1 = vld [vmem:[#allocation3 + $0x38] sm:$0xff]   ;;  %1698 = vmatprep.subr.bf16.mxu1 %v1818_v0  ;;  %v1821_v3 = vld [vmem:[#allocation3 + $0x30] sm:$0xff]   ;;  %v1822_v4 = vld [vmem:[#allocation3 + $0x68] sm:$0xff]   ;;  %vm305_vm1 = vcmask 1046528   ;;  %vm827_vm2 = vcmask 1040384  }
  0x36   :  { %1699 = vmatpush3.bf16.msra.mxu1 %v1819_v1  ;;  %v1823_v5 = vld [vmem:[#allocation3 + $0x28] sm:$0xff]   ;;  %v1824_v6 = vld [vmem:[#allocation3 + $0x60] sm:$0xff]   ;;  %v1826_v8 = vld [vmem:[#allocation3 + $0x58] sm:$0xff]   ;;  %vm828_vm3 = vsmask.f32 256 }
  0x37   :  { %1700 = vmatprep.subr.bf16.mxu1 %v1820_v2  ;;  %v1825_v7 = vld [vmem:[#allocation3 + $0x20] sm:$0xff]   ;;  %v1827_v9 = vld [vmem:[#allocation3 + $0x18] sm:$0xff]   ;;  %v1828_v10 = vld [vmem:[#allocation3 + $0x50] sm:$0xff]  }
  0x38   :  { %v72_v11 = vld [vmem:[%s2454_s0] sm:$0xf]  ;;  %v2072_v12 = vld [vmem:[%s2454_s0 + $0x4] sm:$0xf]  ;;  %v74_v15 = vld [vmem:[%s2454_s0 + $0xc] sm:$0xf] }
  0x39   :  { %v1514_v13 = vcombine.low %v72_v11, %v2072_v12  ;;  %v2078_v14 = vld [vmem:[%s2454_s0 + $0x8] ss:$0 sps:$4 sm:$0x11]   ;;  %v2086_v16 = vld [vmem:[%s2454_s0 + $0x10] sm:$0xf]  ;;  %v1832_v30 = vld [vmem:[#allocation3 + $0x40] sm:$0xff]  }
  0x3a   :  { %1701 = vmatpush3.bf16.msra.mxu1 %v1821_v3  ;;  %v1829_v17 = vld [vmem:[#allocation3 + $0x10] sm:$0xff]   ;;  %v185_v20 = vshll.u32 %v2078_v14, 16  ;;  %v1515_v21 = vcombine.low %v74_v15, %v2086_v16  ;;  %v1830_v22 = vld [vmem:[#allocation3 + $0x48] sm:$0xff]   ;;  %v76_v27 = vld [vmem:[%s2454_s0 + $0x18] sm:$0xf] }
  0x3b   :  { %1702 = vmatprep.subr.bf16.mxu1 %v1822_v4  ;;  %v178_v18 = vshrl.u32 %v1514_v13, 16  ;;  %v180_v19 = vshll.u32 %v1514_v13, 16  ;;  %v2093_v23 = vld [vmem:[%s2454_s0 + $0x14] ss:$0 sps:$4 sm:$0x11]   ;;  %v1831_v29 = vld [vmem:[#allocation3 + $0x8] sm:$0xff]   ;;  %vm2248_vm4 = vmand %vm827_vm2, %vm828_vm3 }
  0x3c   :  { %v187_v25 = vrot.slane %v185_v20, 1  ;;  %v192_v26 = vshll.u32 %v1515_v21, 16  ;;  %v2101_v28 = vld [vmem:[%s2454_s0 + $0x1c] sm:$0xf]  ;;  %v190_v32 = vshrl.u32 %v1515_v21, 16  ;;  %v197_v34 = vshll.u32 %v2093_v23, 16 }
  0x3d   :  { %v182_v24 = vrot.slane %v180_v19, 1  ;;  %v2105_v35 = vcombine.low %v76_v27, %v2101_v28  ;;  %v2111_v37 = vld [vmem:[%s2454_s0 + $0x20] ss:$0 sps:$4 sm:$0x11]   ;;  %v1836_v39 = vld [vmem:[#allocation3 + $0xb8] sm:$0xff]   ;;  %v1839_v47 = vld [vmem:[#allocation3 + $0xb0] sm:$0xff]  }
  0x3e   :  { %1703 = vmatpush3.bf16.msra.mxu1 %v1823_v5  ;;  %v194_v33 = vrot.slane %v192_v26, 1  ;;  %v1833_v38 = vld [vmem:[#allocation3] sm:$0xff]   ;;  %v199_v41 = vrot.slane %v197_v34, 1  ;;  %v2120_v44 = vld [vmem:[%s2454_s0 + $0x28] sm:$0xf]  ;;  %v209_v49 = vshll.u32 %v2111_v37, 16 }
  0x3f   :  { %1704 = vmatprep.subr.bf16.mxu1 %v1824_v6  ;;  %v183_v31 = vor.u32 %v182_v24, %v178_v18  ;;  %v204_v42 = vshll.u32 %v2105_v35, 16  ;;  %v78_v43 = vld [vmem:[%s2454_s0 + $0x24] sm:$0xf]  ;;  %v202_v45 = vshrl.u32 %v2105_v35, 16  ;;  %v1842_v52 = vld [vmem:[#allocation3 + $0xa8] sm:$0xff]   ;;  %v1848_v3 = vld [vmem:[#allocation3 + $0x98] sm:$0xff]  }
  0x40   :  { %v195_v40 = vor.u32 %v194_v33, %v190_v32  ;;  %v2126_v50 = vcombine.low %v78_v43, %v2120_v44  ;;  %v2131_v51 = vld [vmem:[%s2454_s0 + $0x2c] ss:$0 sps:$4 sm:$0x11]   ;;  %v211_v54 = vrot.slane %v209_v49, 1  ;;  %v80_v56 = vld [vmem:[%s2454_s0 + $0x30] sm:$0xf] }
  0x41   :  { %v188_v36 = vsel %vm176_vm0, %v183_v31, %v187_v25  ;;  %v206_v48 = vrot.slane %v204_v42, 1  ;;  %v2140_v57 = vld [vmem:[%s2454_s0 + $0x34] sm:$0xf]  ;;  %v221_v58 = vshll.u32 %v2131_v51, 16  ;;  %v1845_v62 = vld [vmem:[#allocation3 + $0xa0] sm:$0xff]   ;;  %v307_v5 = vrot.slane %v2078_v14, 1 }
  0x42   :  { %1705 = vmatpush3.bf16.msra.mxu1 %v1825_v7  ;;  %569 = vmatprep.mubr.bf16.mxu1 %v188_v36  ;;  %v200_v46 = vsel %vm176_vm0, %v195_v40, %v199_v41  ;;  %v216_v55 = vshll.u32 %v2126_v50, 16  ;;  %v214_v60 = vshrl.u32 %v2126_v50, 16  ;;  %v2146_v63 = vcombine.low %v80_v56, %v2140_v57  ;;  %v96_v0 = vld [vmem:[%s2454_s0] sm:$0xe]  ;;  %v97_v1 = vld [vmem:[%s2454_s0 + $0xc] sm:$0xe] }
  0x43   :  { %1706 = vmatprep.subr.bf16.mxu1 %v1826_v8  ;;  %v207_v53 = vor.u32 %v206_v48, %v202_v45  ;;  %v223_v2 = vrot.slane %v221_v58, 1  ;;  %v1530_v4 = vcombine.low %v96_v0, %v2072_v12  ;;  %v1531_v6 = vcombine.low %v97_v1, %v2086_v16  ;;  %v82_v11 = vld [vmem:[%s2454_s0 + $0x3c] sm:$0xf]  ;;  %v2170_v12 = vld [vmem:[%s2454_s0 + $0x40] sm:$0xf]  ;;  %v1851_v15 = vld [vmem:[#allocation3 + $0x90] sm:$0xff]  }
  0x44   :  { %v218_v61 = vrot.slane %v216_v55, 1  ;;  %v310_v7 = vrot.slane %v2093_v23, 1  ;;  %v226_v16 = vshrl.u32 %v2146_v63, 16  ;;  %v2184_v23 = vld [vmem:[%s2454_s0 + $0x44] ss:$0 sps:$4 sm:$0x11]  }
  0x45   :  { %v212_v59 = vsel %vm176_vm0, %v207_v53, %v211_v54  ;;  %v309_v14 = vrot.slane %v1531_v6, 1  ;;  %v1854_v24 = vld [vmem:[#allocation3 + $0x88] sm:$0xff]   ;;  %v245_v34 = vshll.u32 %v2184_v23, 16  ;;  %v1857_v36 = vld [vmem:[#allocation3 + $0x80] sm:$0xff]   ;;  %v86_v42 = vld [vmem:[%s2454_s0 + $0x54] sm:$0xf] }
  0x46   :  { %1707 = vmatpush3.bf16.msra.mxu1 %v1827_v9  ;;  %v219_v8 = vor.u32 %v218_v61, %v214_v60  ;;  %v2161_v9 = vld [vmem:[%s2454_s0 + $0x38] ss:$0 sps:$4 sm:$0x11]   ;;  %v84_v25 = vld [vmem:[%s2454_s0 + $0x48] sm:$0xf] }
  0x47   :  { %1708 = vmatprep.subr.bf16.mxu1 %v1828_v10  ;;  %v228_v10 = vshll.u32 %v2146_v63, 16  ;;  %v2175_v18 = vsel %vm305_vm1, %v309_v14, %v310_v7  ;;  %v2192_v26 = vld [vmem:[%s2454_s0 + $0x4c] sm:$0xf]  ;;  %v1853_v40 = vld [vmem:[%s2454_s0 + $0x50] ss:$0 sps:$4 sm:$0x11]  }
  0x48   :  { %v224_v19 = vsel %vm176_vm0, %v219_v8, %v223_v2  ;;  %v87_v43 = vld [vmem:[%s2454_s0 + $0x58] sm:$0xf]  ;;  %v257_v48 = vshll.u32 %v1853_v40, 16  ;;  %v1856_v53 = vld [vmem:[%s2454_s0 + $0x5c] ss:$0 sps:$4 sm:$0x11]  }
  0x49   :  { %v230_v20 = vrot.slane %v228_v10, 1  ;;  %v1521_v49 = vcombine.low %v86_v42, %v87_v43  ;;  %v313_v2 = vrot.slane %v2111_v37, 1  ;;  %v316_v37 = vrot.slane %v2131_v51, 1  ;;  %v1890_v42 = vld [vmem:[#allocation7 + $0xf4] ss:$8 sps:$4 sm:$0xff]  }
  0x4a   :  { %1709 = vmatpush3.bf16.msra.mxu1 %v1829_v17  ;;  %v319_v10 = vrot.slane %v2161_v9, 1 }
  0x4b   :  { %1710 = vmatprep.subr.bf16.mxu1 %v1830_v22  ;;  %v1519_v22 = vcombine.low %v82_v11, %v2170_v12  ;;  %v231_v27 = vor.u32 %v230_v20, %v226_v16  ;;  %v264_v54 = vshll.u32 %v1521_v49, 16  ;;  %v262_v56 = vshrl.u32 %v1521_v49, 16  ;;  %v101_v11 = vld [vmem:[%s2454_s0 + $0x3c] sm:$0xe] }
  0x4d   :  { %v238_v31 = vshrl.u32 %v1519_v22, 16  ;;  %v266_v58 = vrot.slane %v264_v54, 1  ;;  %v1902_v54 = vld [vmem:[#allocation7 + $0xb4] ss:$8 sps:$4 sm:$0xff]  }
  0x4e   :  { %1711 = vmatpush3.bf16.msra.mxu1 %v1831_v29 }
  0x4f   :  { %1712 = vmatprep.subr.bf16.mxu1 %v1832_v30  ;;  %v240_v30 = vshll.u32 %v1519_v22, 16  ;;  %v267_v60 = vor.u32 %v266_v58, %v262_v56  ;;  %v1904_v56 = vld [vmem:[#allocation7 + $0xb0] ss:$8 sps:$4 sm:$0xff]   ;;  %v830_v58 = vld [vmem:[#allocation2 + $0x8] sm:$0x1] }
  0x51   :  { %v242_v33 = vrot.slane %v240_v30, 1  ;;  %v1874_v30 = vld [vmem:[#allocation7 + $0x50] ss:$8 sps:$4 sm:$0xff]  }
  0x52   :  { %1713 = vmatpush3.bf16.msra.mxu1 %v1833_v38 }
  0x53   :  { %1778 = vmatprep.subr.bf16.mxu1 %v1836_v39  ;;  %v243_v38 = vor.u32 %v242_v33, %v238_v31  ;;  %v1875_v31 = vld [vmem:[#allocation7 + $0x44] ss:$8 sps:$4 sm:$0xff]   ;;  %v1878_v33 = vld [vmem:[#allocation7 + $0x34] ss:$8 sps:$4 sm:$0xff]  }
  0x55   :  { %570 = vmatmul.mubr.bf16.vlgmr.msra.gmra.mxu1 %v1514_v13  ;;  %v306_v13 = vrot.slane %v1530_v4, 1  ;;  %v100_v4 = vld [vmem:[%s2454_s0 + $0x30] sm:$0xe] }
  0x56   :  { %1779 = vmatpush3.bf16.msra.mxu1 %v1836_v39  ;;  %577 = vmatprep.mubr.bf16.mxu1 %v200_v46  ;;  %v247_v39 = vrot.slane %v245_v34, 1  ;;  %v1534_v7 = vcombine.low %v100_v4, %v2140_v57  ;;  %v1535_v57 = vcombine.low %v101_v11, %v2170_v12  ;;  %v1880_v34 = vld [vmem:[#allocation7 + $0x30] ss:$8 sps:$4 sm:$0xff]   ;;  %v848_v11 = vld [vmem:[#allocation2 + $0x50] sm:$0x1] }
  0x57   :  { %1780 = vmatprep.subr.bf16.mxu1 %v1839_v47  ;;  %v308_v17 = vsel %vm305_vm1, %v306_v13, %v307_v5 }
  0x58   :  { %v248_v46 = vsel %vm176_vm0, %v243_v38, %v247_v39  ;;  %v318_v8 = vrot.slane %v1534_v7, 1  ;;  %v321_v51 = vrot.slane %v1535_v57, 1  ;;  %v1884_v38 = vld [vmem:[#allocation7 + $0x14] ss:$8 sps:$4 sm:$0xff]   ;;  %v1886_v39 = vld [vmem:[#allocation7 + $0x10] ss:$8 sps:$4 sm:$0xff]  }
  0x5a   :  { %1781 = vmatpush3.bf16.msra.mxu1 %v1839_v47  ;;  %v320_v14 = vsel %vm305_vm1, %v318_v8, %v319_v10  ;;  %v851_v8 = vld [vmem:[#allocation2 + $0x5c] sm:$0x1] }
  0x5b   :  { %1782 = vmatprep.subr.bf16.mxu1 %v1842_v52  ;;  %v852_v10 = vsel %vm2248_vm4, 0, %v851_v8 }
  0x5c   :  { %853 = vst [vmem:[#allocation2 + $0x5c] sm:$0x1] %v852_v10 }
  0x5d   :  { %578 = vmatmul.mubr.bf16.gmra.mxu1 %v1515_v21  ;;  %v233_v21 = vshll.u32 %v2161_v9, 16  ;;  %v322_v9 = vrot.slane %v2184_v23, 1  ;;  %v1868_v23 = vld [vmem:[#allocation7 + $0x70] ss:$8 sps:$4 sm:$0xff]  }
  0x5e   :  { %585 = vmatprep.mubr.bf16.mxu1 %v212_v59  ;;  %1783 = vmatpush3.bf16.msra.mxu1 %v1842_v52  ;;  %v259_v52 = vrot.slane %v257_v48, 1  ;;  %v269_v59 = vshll.u32 %v1856_v53, 16  ;;  %v1898_v48 = vld [vmem:[#allocation7 + $0xd0] ss:$8 sps:$4 sm:$0xff]  }
  0x5f   :  { %1784 = vmatprep.subr.bf16.mxu1 %v1845_v62  ;;  %v235_v29 = vrot.slane %v233_v21, 1 }
  0x60   :  { %v271_v61 = vrot.slane %v269_v59, 1  ;;  %v831_v59 = vsel %vm2248_vm4, 0, %v830_v58 }
  0x61   :  { %v236_v32 = vsel %vm176_vm0, %v231_v27, %v235_v29  ;;  %v1871_v27 = vld [vmem:[#allocation7 + $0x60] ss:$8 sps:$4 sm:$0xff]   ;;  %v1872_v29 = vld [vmem:[#allocation7 + $0x54] ss:$8 sps:$4 sm:$0xff]   ;;  %832 = vst [vmem:[#allocation2 + $0x8] sm:$0x1] %v831_v59 }
  0x62   :  { %1785 = vmatpush3.bf16.msra.mxu1 %v1845_v62  ;;  %v272_v62 = vsel %vm176_vm0, %v267_v60, %v271_v61  ;;  %v1905_v60 = vld [vmem:[#allocation7 + $0xa4] ss:$8 sps:$4 sm:$0xff]   ;;  %v1907_v61 = vld [vmem:[#allocation7 + $0xa0] ss:$8 sps:$4 sm:$0xff]  }
  0x63   :  { %1786 = vmatprep.subr.bf16.mxu1 %v1848_v3 }
  0x65   :  { %586 = vmatmul.mubr.bf16.gmra.mxu1 %v2105_v35  ;;  %v1520_v35 = vcombine.low %v84_v25, %v2192_v26  ;;  %v1866_v25 = vld [vmem:[#allocation7 + $0x74] ss:$8 sps:$4 sm:$0xff]  }
  0x66   :  { %593 = vmatprep.mubr.bf16.mxu1 %v224_v19  ;;  %1787 = vmatpush3.bf16.msra.mxu1 %v1848_v3  ;;  %v99_v3 = vld [vmem:[%s2454_s0 + $0x24] sm:$0xe]  ;;  %v323_v19 = vsel %vm305_vm1, %v321_v51, %v322_v9 }
  0x67   :  { %1788 = vmatprep.subr.bf16.mxu1 %v1851_v15  ;;  %v252_v41 = vshll.u32 %v1520_v35, 16  ;;  %v250_v45 = vshrl.u32 %v1520_v35, 16  ;;  %v1533_v5 = vcombine.low %v99_v3, %v2120_v44  ;;  %v102_v44 = vld [vmem:[%s2454_s0 + $0x48] sm:$0xe]  ;;  %1250 = vmatprep.subr.bf16.mxu0 %v1866_v25 }
  0x68   :  { %1251 = vmatpush1.bf16.msra.mxu0 %v1868_v23 }
  0x69   :  { %v254_v47 = vrot.slane %v252_v41, 1  ;;  %v1889_v41 = vld [vmem:[#allocation7] ss:$8 sps:$4 sm:$0xff]  }
  0x6a   :  { %1789 = vmatpush3.bf16.msra.mxu1 %v1851_v15  ;;  %v1536_v15 = vcombine.low %v102_v44, %v2192_v26  ;;  %v1869_v26 = vld [vmem:[#allocation7 + $0x64] ss:$8 sps:$4 sm:$0xff]   ;;  %v849_v44 = vsel %vm2248_vm4, 0, %v848_v11 }
  0x6b   :  { %1790 = vmatprep.subr.bf16.mxu1 %v1854_v24  ;;  %1252 = vmatprep.subr.bf16.mxu0 %v1869_v26  ;;  %850 = vst [vmem:[#allocation2 + $0x50] sm:$0x1] %v849_v44 }
  0x6c   :  { %v324_v16 = vrot.slane %v1536_v15, 1  ;;  %1253 = vmatpush1.bf16.msra.mxu0 %v1871_v27 }
  0x6d   :  { %594 = vmatmul.mubr.bf16.gmra.mxu1 %v2126_v50  ;;  %v255_v50 = vor.u32 %v254_v47, %v250_v45  ;;  %1254 = vmatprep.subr.bf16.mxu0 %v1872_v29  ;;  %v1893_v45 = vld [vmem:[#allocation7 + $0xe4] ss:$8 sps:$4 sm:$0xff]   ;;  %v1896_v47 = vld [vmem:[#allocation7 + $0xd4] ss:$8 sps:$4 sm:$0xff]  }
  0x6e   :  { %601 = vmatprep.mubr.bf16.mxu1 %v236_v32  ;;  %1791 = vmatpush3.bf16.msra.mxu1 %v1854_v24  ;;  %v1877_v32 = vld [vmem:[#allocation7 + $0x40] ss:$8 sps:$4 sm:$0xff]  }
  0x6f   :  { %1792 = vmatprep.subr.bf16.mxu1 %v1857_v36  ;;  %v260_v55 = vsel %vm176_vm0, %v255_v50, %v259_v52  ;;  %v1901_v50 = vld [vmem:[#allocation7 + $0xc0] ss:$8 sps:$4 sm:$0xff]  }
  0x70   :  { %1255 = vmatpush1.bf16.msra.mxu0 %v1874_v30 }
  0x71   :  { %1256 = vmatprep.subr.bf16.mxu0 %v1875_v31 }
  0x72   :  { %1793 = vmatpush3.bf16.msra.mxu1 %v1857_v36  ;;  %v1883_v36 = vld [vmem:[#allocation7 + $0x20] ss:$8 sps:$4 sm:$0xff]  }
  0x74   :  { %1257 = vmatpush1.bf16.msra.mxu0 %v1877_v32 }
  0x75   :  { %602 = vmatmul.mubr.bf16.gmra.mxu1 %v2146_v63  ;;  %v98_v63 = vld [vmem:[%s2454_s0 + $0x18] sm:$0xe]  ;;  %1258 = vmatprep.subr.bf16.mxu0 %v1878_v33 }
  0x76   :  { %609 = vmatprep.mubr.bf16.mxu1 %v248_v46  ;;  %v1532_v0 = vcombine.low %v98_v63, %v2101_v28  ;;  %v315_v28 = vrot.slane %v1533_v5, 1  ;;  %v1895_v46 = vld [vmem:[#allocation7 + $0xe0] ss:$8 sps:$4 sm:$0xff]   ;;  %v1910_v63 = vld [vmem:[#allocation7 + $0x90] ss:$8 sps:$4 sm:$0xff]  }
  0x77   :  { %v1913_v5 = vld [vmem:[#allocation7 + $0x80] ss:$8 sps:$4 sm:$0xff]  }
  0x78   :  { %v312_v1 = vrot.slane %v1532_v0, 1  ;;  %v317_v13 = vsel %vm305_vm1, %v315_v28, %v316_v37  ;;  %1259 = vmatpush1.bf16.msra.mxu0 %v1880_v34  ;;  %v836_v0 = vld [vmem:[#allocation2 + $0x20] sm:$0x1]  ;;  %v842_v28 = vld [vmem:[#allocation2 + $0x38] sm:$0x1] }
  0x79   :  { %v837_v3 = vsel %vm2248_vm4, 0, %v836_v0  ;;  %v843_v37 = vsel %vm2248_vm4, 0, %v842_v28 }
  0x7a   :  { %v314_v6 = vsel %vm305_vm1, %v312_v1, %v313_v2  ;;  %v839_v1 = vld [vmem:[#allocation2 + $0x2c] sm:$0x1]  ;;  %v1911_v2 = vld [vmem:[#allocation7 + $0x84] ss:$8 sps:$4 sm:$0xff]   ;;  %838 = vst [vmem:[#allocation2 + $0x20] sm:$0x1] %v837_v3 }
  0x7b   :  { %v840_v4 = vsel %vm2248_vm4, 0, %v839_v1  ;;  %844 = vst [vmem:[#allocation2 + $0x38] sm:$0x1] %v843_v37 }
  0x7c   :  { %841 = vst [vmem:[#allocation2 + $0x2c] sm:$0x1] %v840_v4 }
  0x7d   :  { %610 = vmatmul.mubr.bf16.gmra.mxu1 %v1519_v22  ;;  %v328_v22 = vrot.slane %v1856_v53, 1  ;;  %v833_v53 = vld [vmem:[#allocation2 + $0x14] sm:$0x1] }
  0x7e   :  { %617 = vmatprep.mubr.bf16.mxu1 %v260_v55  ;;  %v834_v55 = vsel %vm2248_vm4, 0, %v833_v53 }
  0x7f   :  { %835 = vst [vmem:[#allocation2 + $0x14] sm:$0x1] %v834_v55 }
  0x85   :  { %618 = vmatmul.mubr.bf16.gmra.mxu1 %v1520_v35  ;;  %v1881_v35 = vld [vmem:[#allocation7 + $0x24] ss:$8 sps:$4 sm:$0xff]  }
  0x86   :  { %625 = vmatprep.mubr.bf16.mxu1 %v272_v62  ;;  %1260 = vmatprep.subr.bf16.mxu0 %v1881_v35  ;;  %v1908_v62 = vld [vmem:[#allocation7 + $0x94] ss:$8 sps:$4 sm:$0xff]  }
  0x87   :  { %1261 = vmatpush1.bf16.msra.mxu0 %v1883_v36 }
  0x88   :  { %1262 = vmatprep.subr.bf16.mxu0 %v1884_v38 }
  0x8b   :  { %1263 = vmatpush1.bf16.msra.mxu0 %v1886_v39 }
  0x8d   :  { %626 = vmatmul.mubr.bf16.gmra.mxu1 %v1521_v49  ;;  %v1899_v49 = vld [vmem:[#allocation7 + $0xc4] ss:$8 sps:$4 sm:$0xff]  }
  0x8e   :  { %1794 = vmatprep.mubr.bf16.mxu1 %v308_v17  ;;  %v325_v17 = vrot.slane %v1853_v40, 1  ;;  %v1887_v40 = vld [vmem:[#allocation7 + $0x4] ss:$8 sps:$4 sm:$0xff]  }
  0x8f   :  { %1264 = vmatprep.subr.bf16.mxu0 %v1887_v40 }
  0x90   :  { %v326_v12 = vsel %vm305_vm1, %v324_v16, %v325_v17  ;;  %1265 = vmatpush1.bf16.msra.mxu0 %v1889_v41 }
  0x91   :  { %1266 = vmatprep.subr.bf16.mxu0 %v1890_v42 }
  0x95   :  { %1795 = vmatmul.mubr.bf16.vlgmr.msra.gmra.mxu1 %v2175_v18  ;;  %v103_v18 = vld [vmem:[%s2454_s0 + $0x54] sm:$0xe] }
  0x96   :  { %1798 = vmatprep.mubr.bf16.mxu1 %v314_v6  ;;  %v1537_v20 = vcombine.low %v103_v18, %v87_v43  ;;  %v1892_v43 = vld [vmem:[#allocation7 + $0xf0] ss:$8 sps:$4 sm:$0xff]   ;;  %v845_v6 = vld [vmem:[#allocation2 + $0x44] sm:$0x1] }
  0x97   :  { %1267 = vmatpush2.bf16.msra.mxu0 %v1892_v43  ;;  %v846_v7 = vsel %vm2248_vm4, 0, %v845_v6 }
  0x98   :  { %v327_v21 = vrot.slane %v1537_v20, 1  ;;  %1268 = vmatprep.subr.bf16.mxu0 %v1893_v45  ;;  %847 = vst [vmem:[#allocation2 + $0x44] sm:$0x1] %v846_v7 }
  0x9a   :  { %v329_v24 = vsel %vm305_vm1, %v327_v21, %v328_v22 }
  0x9b   :  { %1269 = vmatpush2.bf16.msra.mxu0 %v1895_v46  ;;  %v2284_v46 = vld [vmem:[#allocation5] ss:$0 sm:$0xff] }
  0x9c   :  { %1270 = vmatprep.subr.bf16.mxu0 %v1896_v47 }
  0x9d   :  { %1799 = vmatmul.mubr.bf16.gmra.mxu1 %v317_v13 }
  0x9e   :  { %1802 = vmatprep.mubr.bf16.mxu1 %v320_v14 }
  0x9f   :  { %1271 = vmatpush2.bf16.msra.mxu0 %v1898_v48 }
  0xa0   :  { %1272 = vmatprep.subr.bf16.mxu0 %v1899_v49 }
  0xa3   :  { %1273 = vmatpush2.bf16.msra.mxu0 %v1901_v50 }
  0xa4   :  { %1274 = vmatprep.subr.bf16.mxu0 %v1902_v54 }
  0xa5   :  { %1803 = vmatmul.mubr.bf16.gmra.mxu1 %v323_v19 }
  0xa6   :  { %1806 = vmatprep.mubr.bf16.mxu1 %v326_v12 }
  0xa7   :  { %1275 = vmatpush2.bf16.msra.mxu0 %v1904_v56 }
  0xa8   :  { %1276 = vmatprep.subr.bf16.mxu0 %v1905_v60 }
  0xab   :  { %1277 = vmatpush2.bf16.msra.mxu0 %v1907_v61 }
  0xac   :  { %1278 = vmatprep.subr.bf16.mxu0 %v1908_v62 }
  0xad   :  { %1807 = vmatmul.mubr.bf16.gmra.mxu1 %v329_v24 }
  0xaf   :  { %1279 = vmatpush2.bf16.msra.mxu0 %v1910_v63 }
  0xb0   :  { %1280 = vmatprep.subr.bf16.mxu0 %v1911_v2 }
  0xb3   :  { %1281 = vmatpush2.bf16.msra.mxu0 %v1913_v5 }
 0x115   :  { %v1714_v13 = vpop.f32.mrf.mxu1 }
 0x117   :  { %v1715_v57 = vpop.f32.mrf.mxu1 }
 0x118   :  { %v1716_v14 = vadd.f32 %v1715_v57, %v1714_v13 }
 0x119   :  { %v1717_v15 = vpop.f32.mrf.mxu1 }
 0x11a   :  { %v572_v56 = vadd.f32 %v1716_v14, %v2284_v46 }
 0x11b   :  { %v1718_v51 = vpop.f32.mrf.mxu1 }
 0x11c   :  { %v1719_v50 = vadd.f32 %v1718_v51, %v1717_v15 }
 0x11d   :  { %v1720_v9 = vpop.f32.mrf.mxu1 }
 0x11e   :  { %v575_v63 = vadd.f32 %v1719_v50, %v2284_v46 }
 0x11f   :  { %v1721_v16 = vpop.f32.mrf.mxu1 }
 0x120   :  { %v1722_v42 = vadd.f32 %v1721_v16, %v1720_v9 }
 0x121   :  { %v1723_v17 = vpop.f32.mrf.mxu1 }
 0x122   :  { %v580_v48 = vadd.f32 %v1722_v42, %v2284_v46 }
 0x123   :  { %v1724_v18 = vpop.f32.mrf.mxu1 }
 0x124   :  { %v1725_v47 = vadd.f32 %v1724_v18, %v1723_v17 }
 0x125   :  { %v1726_v19 = vpop.f32.mrf.mxu1 }
 0x126   :  { %v583_v58 = vadd.f32 %v1725_v47, %v2284_v46 }
 0x127   :  { %v1727_v20 = vpop.f32.mrf.mxu1 }
 0x128   :  { %v1728_v0 = vadd.f32 %v1727_v20, %v1726_v19 }
 0x129   :  { %v1729_v12 = vpop.f32.mrf.mxu1 }
 0x12a   :  { %v588_v11 = vadd.f32 %v1728_v0, %v2284_v46 }
 0x12b   :  { %v1730_v21 = vpop.f32.mrf.mxu1 }
 0x12c   :  { %v1731_v6 = vadd.f32 %v1730_v21, %v1729_v12  ;;  %v1915_v12 = vld [vmem:[#allocation2 + $0x8] ss:$0 sps:$4 sm:$0x11]  }
 0x12d   :  { %v1732_v22 = vpop.f32.mrf.mxu1 }
 0x12e   :  { %v591_v18 = vadd.f32 %v1731_v6, %v2284_v46 }
 0x12f   :  { %v1733_v24 = vpop.f32.mrf.mxu1 }
 0x130   :  { %v1734_v54 = vadd.f32 %v1733_v24, %v1732_v22 }
 0x131   :  { %v1735_v25 = vpop.f32.mrf.mxu1 }
 0x132   :  { %v596_v5 = vadd.f32 %v1734_v54, %v2284_v46 }
 0x133   :  { %v1736_v23 = vpop.f32.mrf.mxu1 }
 0x134   :  { %v1737_v2 = vadd.f32 %v1736_v23, %v1735_v25 }
 0x135   :  { %v1738_v26 = vpop.f32.mrf.mxu1 }
 0x136   :  { %v599_v15 = vadd.f32 %v1737_v2, %v2284_v46 }
 0x137   :  { %v1739_v27 = vpop.f32.mrf.mxu1 }
 0x138   :  { %v1740_v19 = vadd.f32 %v1739_v27, %v1738_v26 }
 0x139   :  { %v2268_v29 = vpop.f32.mrf.mxu1 }
 0x13b   :  { %v2270_v30 = vpop.f32.mrf.mxu1 }
 0x13c   :  { %v1743_v23 = vadd.f32 %v2270_v30, %v2268_v29 }
 0x13d   :  { %v1744_v31 = vpop.f32.mrf.mxu1 }
 0x13e   :  { %v607_v54 = vadd.f32 %v1743_v23, %v2284_v46 }
 0x13f   :  { %v1745_v32 = vpop.f32.mrf.mxu1 }
 0x140   :  { %v1746_v13 = vadd.f32 %v1745_v32, %v1744_v31  ;;  %v1917_v32 = vld [vmem:[#allocation2 + $0x14] ss:$0 sps:$4 sm:$0x11]  }
 0x141   :  { %v1747_v33 = vpop.f32.mrf.mxu1 }
 0x142   :  { %v612_v25 = vadd.f32 %v1746_v13, %v2284_v46 }
 0x143   :  { %v1748_v34 = vpop.f32.mrf.mxu1 }
 0x144   :  { %v1749_v21 = vadd.f32 %v1748_v34, %v1747_v33  ;;  %v950_v33 = vshll.u32 %v1915_v12, 16 }
 0x145   :  { %v2272_v35 = vpop.f32.mrf.mxu1 }
 0x146   :  { %v615_v29 = vadd.f32 %v1749_v21, %v2284_v46 }
 0x147   :  { %v2274_v36 = vpop.f32.mrf.mxu1 }
 0x149   :  { %v2276_v38 = vpop.f32.mrf.mxu1 }
 0x14b   :  { %v2278_v39 = vpop.f32.mrf.mxu1 }
 0x14d   :  { %v1756_v40 = vpop.f32.mrf.mxu1 }
 0x14f   :  { %v1757_v41 = vpop.f32.mrf.mxu1 }
 0x150   :  { %v1758_v27 = vadd.f32 %v1757_v41, %v1756_v40 }
 0x151   :  { %v2280_v43 = vpop.f32.mrf.mxu1 }
 0x153   :  { %v2282_v45 = vpop.f32.mrf.mxu1 }
 0x154   :  { %v1761_v2 = vadd.f32 %v2282_v45, %v2280_v43 }
 0x155   :  { %v1796_v49 = vpop.f32.mrf.mxu1 }
 0x156   :  { %v677_v52 = vadd.f32 %v1796_v49, %v580_v48 }
 0x157   :  { %v668_v53 = vpop.f32.mrf.mxu1 }
 0x158   :  { %v2287_v55 = vmax.f32 %v677_v52, 0.0  ;;  %v669_v61 = vadd.f32 %v668_v53, %v572_v56  ;;  %v604_v53 = vadd.f32 %v1740_v19, %v2284_v46 }
 0x159   :  { %v1797_v59 = vpop.f32.mrf.mxu1 }
 0x15a   :  { %v1645_v60 = vpack.c.bf16 %v2287_v55, %v2287_v55  ;;  %v680_v62 = vadd.f32 %v1797_v59, %v583_v58  ;;  %v731_v28 = vmax.f32 %v669_v61, 0.0  ;;  %v962_v58 = vshll.u32 %v1917_v32, 16 }
 0x15b   :  { %v671_v1 = vpop.f32.mrf.mxu1  ;;  %v1752_v61 = vadd.f32 %v2274_v36, %v2272_v35 }
 0x15c   :  { %813 = vst [vmem:[#allocation2 + $0xc] sm:$0xf] %v1645_v60  ;;  %v2294_v3 = vmax.f32 %v680_v62, 0.0  ;;  %v672_v4 = vadd.f32 %v671_v1, %v575_v63  ;;  %v628_v63 = vadd.f32 %v1758_v27, %v2284_v46  ;;  %v952_v1 = vrot.slane %v950_v33, 1 }
 0x15d   :  { %v1800_v7 = vpop.f32.mrf.mxu1 }
 0x15e   :  { %v1646_v37 = vpack.c.bf16 %v2294_v3, %v2294_v3  ;;  %v732_v8 = vmax.f32 %v672_v4, 0.0  ;;  %v693_v10 = vadd.f32 %v1800_v7, %v596_v5  ;;  %v1755_v7 = vadd.f32 %v2278_v39, %v2276_v38 }
 0x15f   :  { %v684_v44 = vpop.f32.mrf.mxu1  ;;  %v620_v38 = vadd.f32 %v1752_v61, %v2284_v46  ;;  %v631_v39 = vadd.f32 %v1761_v2, %v2284_v46 }
 0x160   :  { %814 = vst [vmem:[#allocation2 + $0x10] sm:$0xf] %v1646_v37  ;;  %v2300_v57 = vpack.c.bf16 %v732_v8, %v731_v28  ;;  %v2302_v14 = vmax.f32 %v693_v10, 0.0  ;;  %v685_v16 = vadd.f32 %v684_v44, %v588_v11 }
 0x161   :  { %v1801_v51 = vpop.f32.mrf.mxu1 }
 0x162   :  { %1679 = vst [vmem:[#allocation2] sm:$0xff] %v2300_v57   ;;  %v1649_v9 = vpack.c.bf16 %v2302_v14, %v2302_v14  ;;  %v696_v17 = vadd.f32 %v1801_v51, %v599_v15  ;;  %v735_v42 = vmax.f32 %v685_v16, 0.0  ;;  %v964_v15 = vrot.slane %v962_v58, 1  ;;  %v1919_v51 = vld [vmem:[#allocation2 + $0x20] ss:$0 sps:$4 sm:$0x11]  }
 0x163   :  { %v687_v20 = vpop.f32.mrf.mxu1  ;;  %v974_v32 = vshll.u32 %v1919_v51, 16 }
 0x164   :  { %817 = vst [vmem:[#allocation2 + $0x24] sm:$0xf] %v1649_v9  ;;  %v2309_v22 = vmax.f32 %v696_v17, 0.0  ;;  %v688_v24 = vadd.f32 %v687_v20, %v591_v18 }
 0x165   :  { %v1804_v31 = vpop.f32.mrf.mxu1 }
 0x166   :  { %v1650_v47 = vpack.c.bf16 %v2309_v22, %v2309_v22  ;;  %v736_v48 = vmax.f32 %v688_v24, 0.0  ;;  %v709_v26 = vadd.f32 %v1804_v31, %v612_v25  ;;  %v623_v24 = vadd.f32 %v1755_v7, %v2284_v46  ;;  %v1925_v7 = vld [vmem:[#allocation2 + $0x44] ss:$0 sps:$4 sm:$0x11]  }
 0x167   :  { %v700_v49 = vpop.f32.mrf.mxu1  ;;  %v1916_v34 = vld [vmem:[#allocation2 + $0xc] sm:$0xff]  }
 0x168   :  { %818 = vst [vmem:[#allocation2 + $0x28] sm:$0xf] %v1650_v47  ;;  %v2316_v50 = vpack.c.bf16 %v736_v48, %v735_v42  ;;  %v2318_v52 = vmax.f32 %v709_v26, 0.0  ;;  %v701_v41 = vadd.f32 %v700_v49, %v604_v53  ;;  %v957_v60 = vshll.u32 %v1916_v34, 16 }
 0x169   :  { %v1805_v30 = vpop.f32.mrf.mxu1  ;;  %v1914_v56 = vld [vmem:[#allocation2] sm:$0xff]   ;;  %v955_v35 = vshrl.u32 %v1916_v34, 16  ;;  %v1921_v34 = vld [vmem:[#allocation2 + $0x2c] ss:$0 sps:$4 sm:$0x11]  }
 0x16a   :  { %1695 = vst [vmem:[#allocation2 + $0x18] sm:$0xff] %v2316_v50   ;;  %v1653_v40 = vpack.c.bf16 %v2318_v52, %v2318_v52  ;;  %v712_v59 = vadd.f32 %v1805_v30, %v615_v29  ;;  %v945_v0 = vshll.u32 %v1914_v56, 16  ;;  %v959_v6 = vrot.slane %v957_v60, 1 }
 0x16b   :  { %v703_v62 = vpop.f32.mrf.mxu1  ;;  %v943_v37 = vshrl.u32 %v1914_v56, 16  ;;  %v739_v36 = vmax.f32 %v701_v41, 0.0  ;;  %v986_v56 = vshll.u32 %v1921_v34, 16 }
 0x16c   :  { %821 = vst [vmem:[#allocation2 + $0x3c] sm:$0xf] %v1653_v40  ;;  %v2331_v4 = vmax.f32 %v712_v59, 0.0  ;;  %v704_v5 = vadd.f32 %v703_v62, %v607_v54  ;;  %v947_v8 = vrot.slane %v945_v0, 1  ;;  %v960_v45 = vor.u32 %v959_v6, %v955_v35 }
 0x16d   :  { %v1808_v28 = vpop.f32.mrf.mxu1  ;;  %v748_v54 = vpack.c.bf16 %v2294_v3, %v2287_v55  ;;  %v988_v60 = vrot.slane %v986_v56, 1  ;;  %v1923_v62 = vld [vmem:[#allocation2 + $0x38] ss:$0 sps:$4 sm:$0x11]  }
 0x16e   :  { %v1654_v10 = vpack.c.bf16 %v2331_v4, %v2331_v4  ;;  %v740_v11 = vmax.f32 %v704_v5, 0.0  ;;  %v725_v44 = vadd.f32 %v1808_v28, %v628_v63  ;;  %v948_v43 = vor.u32 %v947_v8, %v943_v37 }
 0x16f   :  { %v716_v13 = vpop.f32.mrf.mxu1  ;;  %v965_v23 = vsel %vm176_vm0, %v960_v45, %v964_v15  ;;  %v1920_v42 = vld [vmem:[#allocation2 + $0x24] sm:$0xff]   ;;  %v998_v2 = vshll.u32 %v1923_v62, 16  ;;  %v750_v37 = vpack.c.bf16 %v2309_v22, %v2302_v14 }
 0x170   :  { %822 = vst [vmem:[#allocation2 + $0x40] sm:$0xf] %v1654_v10  ;;  %v2337_v9 = vpack.c.bf16 %v740_v11, %v739_v36  ;;  %v2339_v16 = vmax.f32 %v725_v44, 0.0  ;;  %v953_v18 = vsel %vm176_vm0, %v948_v43, %v952_v1  ;;  %v717_v12 = vadd.f32 %v716_v13, %v620_v38  ;;  %v1927_v13 = vld [vmem:[#allocation2 + $0x50] ss:$0 sps:$4 sm:$0x11]  }
 0x171   :  { %v1809_v17 = vpop.f32.mrf.mxu1  ;;  %v1918_v19 = vld [vmem:[#allocation2 + $0x18] sm:$0xff]   ;;  %1282 = vmatprep.mubr.bf16.mxu0 %v953_v18  ;;  %v981_v29 = vshll.u32 %v1920_v42, 16  ;;  %v979_v59 = vshrl.u32 %v1920_v42, 16  ;;  %v1000_v6 = vrot.slane %v998_v2, 1  ;;  %v1010_v36 = vshll.u32 %v1925_v7, 16 }
 0x172   :  { %1696 = vst [vmem:[#allocation2 + $0x30] sm:$0xff] %v2337_v9   ;;  %v1657_v20 = vpack.c.bf16 %v2339_v16, %v2339_v16  ;;  %v728_v21 = vadd.f32 %v1809_v17, %v631_v39  ;;  %1283 = vmatmul.mubr.bf16.vlgmr.msra.gmra.mxu0 %v2300_v57  ;;  %v969_v31 = vshll.u32 %v1918_v19, 16  ;;  %v967_v26 = vshrl.u32 %v1918_v19, 16  ;;  %v1929_v17 = vld [vmem:[#allocation2 + $0x5c] ss:$0 sps:$4 sm:$0x11]  }
 0x173   :  { %v719_v25 = vpop.f32.mrf.mxu1  ;;  %1292 = vmatprep.mubr.bf16.mxu0 %v965_v23  ;;  %v743_v49 = vmax.f32 %v717_v12, 0.0  ;;  %v976_v57 = vrot.slane %v974_v32, 1  ;;  %v983_v40 = vrot.slane %v981_v29, 1  ;;  %v1012_v44 = vrot.slane %v1010_v36, 1 }
 0x174   :  { %825 = vst [vmem:[#allocation2 + $0x54] sm:$0xf] %v1657_v20  ;;  %v2350_v47 = vmax.f32 %v728_v21, 0.0  ;;  %v720_v48 = vadd.f32 %v719_v25, %v623_v24  ;;  %v971_v27 = vrot.slane %v969_v31, 1  ;;  %v1022_v51 = vshll.u32 %v1927_v13, 16 }
 0x175   :  { %v984_v61 = vor.u32 %v983_v40, %v979_v59  ;;  %v752_v19 = vpack.c.bf16 %v2331_v4, %v2318_v52  ;;  %v1034_v21 = vshll.u32 %v1929_v17, 16  ;;  %v1080_v32 = vlaneseq  ;;  %v1078_v4 = vld [vmem:[#allocation8] sm:$0x3] }
 0x176   :  { %v1658_v46 = vpack.c.bf16 %v2350_v47, %v2350_v47  ;;  %v744_v33 = vmax.f32 %v720_v48, 0.0  ;;  %v972_v53 = vor.u32 %v971_v27, %v967_v26  ;;  %v1024_v39 = vrot.slane %v1022_v51, 1 }
 0x177   :  { %v989_v0 = vsel %vm176_vm0, %v984_v61, %v988_v60  ;;  %v1924_v55 = vld [vmem:[#allocation2 + $0x3c] sm:$0xff]   ;;  %v1036_v25 = vrot.slane %v1034_v21, 1  ;;  %v754_v31 = vpack.c.bf16 %v2350_v47, %v2339_v16  ;;  %v1081_v42 = vshrl.u32 %v1080_v32, 7 }
 0x178   :  { %826 = vst [vmem:[#allocation2 + $0x58] sm:$0xf] %v1658_v46  ;;  %v753_v30 = vpack.c.bf16 %v744_v33, %v743_v49  ;;  %v977_v58 = vsel %vm176_vm0, %v972_v53, %v976_v57  ;;  %v1005_v28 = vshll.u32 %v1924_v55, 16  ;;  %v1003_v10 = vshrl.u32 %v1924_v55, 16 }
 0x179   :  { %v1922_v41 = vld [vmem:[#allocation2 + $0x30] sm:$0xff]   ;;  %v1082_v52 = vsub.s32 0, %v1081_v42  ;;  %v1086_v48 = vsub.s32 1, %v1081_v42 }
 0x17a   :  { %1697 = vst [vmem:[#allocation2 + $0x48] sm:$0xff] %v753_v30   ;;  %1293 = vmatmul.mubr.bf16.gmra.mxu0 %v748_v54  ;;  %v993_v63 = vshll.u32 %v1922_v41, 16  ;;  %v991_v3 = vshrl.u32 %v1922_v41, 16  ;;  %v1007_v35 = vrot.slane %v1005_v28, 1 }
 0x17b   :  { %1302 = vmatprep.mubr.bf16.mxu0 %v977_v58  ;;  %v2370_v26 = vrot.slane %v1078_v4, %v1082_v52  ;;  %v2372_v27 = vrot.slane %v1078_v4, %v1086_v48 }
 0x17c   :  { %v995_v1 = vrot.slane %v993_v63, 1  ;;  %v1008_v11 = vor.u32 %v1007_v35, %v1003_v10 }
 0x17e   :  { %v996_v5 = vor.u32 %v995_v1, %v991_v3  ;;  %v1013_v45 = vsel %vm176_vm0, %v1008_v11, %v1012_v44 }
 0x17f   :  { %v1928_v38 = vld [vmem:[#allocation2 + $0x54] sm:$0xff]  }
 0x180   :  { %v1001_v8 = vsel %vm176_vm0, %v996_v5, %v1000_v6  ;;  %v1029_v18 = vshll.u32 %v1928_v38, 16 }
 0x182   :  { %1303 = vmatmul.mubr.bf16.gmra.mxu0 %v2316_v50  ;;  %v1926_v50 = vld [vmem:[#allocation2 + $0x48] sm:$0xff]   ;;  %v1031_v12 = vrot.slane %v1029_v18, 1 }
 0x183   :  { %1312 = vmatprep.mubr.bf16.mxu0 %v989_v0  ;;  %v1017_v43 = vshll.u32 %v1926_v50, 16  ;;  %v1015_v14 = vshrl.u32 %v1926_v50, 16 }
 0x185   :  { %v1019_v15 = vrot.slane %v1017_v43, 1 }
 0x187   :  { %v1020_v22 = vor.u32 %v1019_v15, %v1015_v14 }
 0x189   :  { %v1025_v20 = vsel %vm176_vm0, %v1020_v22, %v1024_v39 }
 0x18a   :  { %1313 = vmatmul.mubr.bf16.gmra.mxu0 %v750_v37 }
 0x18b   :  { %1322 = vmatprep.mubr.bf16.mxu0 %v1001_v8 }
 0x192   :  { %1323 = vmatmul.mubr.bf16.gmra.mxu0 %v2337_v9  ;;  %v1027_v9 = vshrl.u32 %v1928_v38, 16 }
 0x193   :  { %1332 = vmatprep.mubr.bf16.mxu0 %v1013_v45 }
 0x194   :  { %v1032_v24 = vor.u32 %v1031_v12, %v1027_v9 }
 0x196   :  { %v1037_v23 = vsel %vm176_vm0, %v1032_v24, %v1036_v25 }
 0x19a   :  { %1333 = vmatmul.mubr.bf16.gmra.mxu0 %v752_v19 }
 0x19b   :  { %1342 = vmatprep.mubr.bf16.mxu0 %v1025_v20 }
 0x1a2   :  { %1343 = vmatmul.mubr.bf16.gmra.mxu0 %v753_v30 }
 0x1a3   :  { %1352 = vmatprep.mubr.bf16.mxu0 %v1037_v23 }
 0x1aa   :  { %1353 = vmatmul.mubr.bf16.gmra.mxu0 %v754_v31 }
 0x232   :  { %v1284_v49 = vpop.f32.mrf.mxu0 }
 0x233   :  { %v1285_v46 = vadd.f32 %v1284_v49, %v2370_v26 }
 0x234   :  { %v1286_v33 = vpop.f32.mrf.mxu0 }
 0x235   :  { %v1287_v34 = vadd.f32 %v1286_v33, %v2372_v27  ;;  %v1363_v57 = vmax.f32 %v1285_v46, 0.0 }
 0x236   :  { %v1288_v53 = vpop.f32.mrf.mxu0 }
 0x237   :  { %v1364_v29 = vmax.f32 %v1287_v34, 0.0  ;;  %v1289_v16 = vadd.f32 %v1288_v53, %v2370_v26 }
 0x238   :  { %v1290_v47 = vpop.f32.mrf.mxu0 }
 0x239   :  { %v1659_v30 = vpack.c.bf16 %v1364_v29, %v1363_v57  ;;  %v1291_v54 = vadd.f32 %v1290_v47, %v2372_v27  ;;  %v1365_v58 = vmax.f32 %v1289_v16, 0.0 }
 0x23a   :  { %v1294_v56 = vpop.f32.mrf.mxu0 }
 0x23b   :  { %1491 = vst [vmem:[%s2459_s5] sm:$0xff] %v1659_v30  ;;  %v1366_v40 = vmax.f32 %v1291_v54, 0.0  ;;  %v1295_v41 = vadd.f32 %v1294_v56, %v2370_v26 }
 0x23c   :  { %v1296_v59 = vpop.f32.mrf.mxu0 }
 0x23d   :  { %v1660_v60 = vpack.c.bf16 %v1366_v40, %v1365_v58  ;;  %v1297_v61 = vadd.f32 %v1296_v59, %v2372_v27  ;;  %v1367_v63 = vmax.f32 %v1295_v41, 0.0 }
 0x23e   :  { %v1298_v62 = vpop.f32.mrf.mxu0 }
 0x23f   :  { %1492 = vst [vmem:[%s2459_s5 + $0x8] sm:$0xff] %v1660_v60  ;;  %v1368_v0 = vmax.f32 %v1297_v61, 0.0  ;;  %v1299_v1 = vadd.f32 %v1298_v62, %v2370_v26 }
 0x240   :  { %v1300_v2 = vpop.f32.mrf.mxu0 }
 0x241   :  { %v1661_v55 = vpack.c.bf16 %v1368_v0, %v1367_v63  ;;  %v1301_v3 = vadd.f32 %v1300_v2, %v2372_v27  ;;  %v1369_v6 = vmax.f32 %v1299_v1, 0.0 }
 0x242   :  { %v1304_v5 = vpop.f32.mrf.mxu0 }
 0x243   :  { %1493 = vst [vmem:[%s2459_s5 + $0x10] sm:$0xff] %v1661_v55  ;;  %v1370_v7 = vmax.f32 %v1301_v3, 0.0  ;;  %v1305_v28 = vadd.f32 %v1304_v5, %v2370_v26 }
 0x244   :  { %v1306_v37 = vpop.f32.mrf.mxu0 }
 0x245   :  { %v1662_v8 = vpack.c.bf16 %v1370_v7, %v1369_v6  ;;  %v1307_v35 = vadd.f32 %v1306_v37, %v2372_v27  ;;  %v1371_v50 = vmax.f32 %v1305_v28, 0.0 }
 0x246   :  { %v1308_v36 = vpop.f32.mrf.mxu0 }
 0x247   :  { %1494 = vst [vmem:[%s2459_s5 + $0x18] sm:$0xff] %v1662_v8  ;;  %v1372_v10 = vmax.f32 %v1307_v35, 0.0  ;;  %v1309_v11 = vadd.f32 %v1308_v36, %v2370_v26 }
 0x248   :  { %v1310_v44 = vpop.f32.mrf.mxu0 }
 0x249   :  { %v1663_v13 = vpack.c.bf16 %v1372_v10, %v1371_v50  ;;  %v1311_v43 = vadd.f32 %v1310_v44, %v2372_v27  ;;  %v1373_v15 = vmax.f32 %v1309_v11, 0.0 }
 0x24a   :  { %v1314_v45 = vpop.f32.mrf.mxu0 }
 0x24b   :  { %1495 = vst [vmem:[%s2459_s5 + $0x20] sm:$0xff] %v1663_v13  ;;  %v1374_v51 = vmax.f32 %v1311_v43, 0.0  ;;  %v1315_v38 = vadd.f32 %v1314_v45, %v2370_v26 }
 0x24c   :  { %v1316_v14 = vpop.f32.mrf.mxu0 }
 0x24d   :  { %v1664_v22 = vpack.c.bf16 %v1374_v51, %v1373_v15  ;;  %v1317_v39 = vadd.f32 %v1316_v14, %v2372_v27  ;;  %v1375_v18 = vmax.f32 %v1315_v38, 0.0 }
 0x24e   :  { %v1318_v17 = vpop.f32.mrf.mxu0 }
 0x24f   :  { %1496 = vst [vmem:[%s2459_s5 + $0x28] sm:$0xff] %v1664_v22  ;;  %v1376_v19 = vmax.f32 %v1317_v39, 0.0  ;;  %v1319_v20 = vadd.f32 %v1318_v17, %v2370_v26 }
 0x250   :  { %v1320_v12 = vpop.f32.mrf.mxu0 }
 0x251   :  { %v1665_v21 = vpack.c.bf16 %v1376_v19, %v1375_v18  ;;  %v1321_v9 = vadd.f32 %v1320_v12, %v2372_v27  ;;  %v1377_v25 = vmax.f32 %v1319_v20, 0.0 }
 0x252   :  { %v1324_v24 = vpop.f32.mrf.mxu0 }
 0x253   :  { %1497 = vst [vmem:[%s2459_s5 + $0x30] sm:$0xff] %v1665_v21  ;;  %v1378_v23 = vmax.f32 %v1321_v9, 0.0  ;;  %v1325_v31 = vadd.f32 %v1324_v24, %v2370_v26 }
 0x254   :  { %v1326_v32 = vpop.f32.mrf.mxu0 }
 0x255   :  { %v1666_v42 = vpack.c.bf16 %v1378_v23, %v1377_v25  ;;  %v1327_v52 = vadd.f32 %v1326_v32, %v2372_v27  ;;  %v1379_v48 = vmax.f32 %v1325_v31, 0.0 }
 0x256   :  { %v1328_v4 = vpop.f32.mrf.mxu0 }
 0x257   :  { %1498 = vst [vmem:[%s2459_s5 + $0x38] sm:$0xff] %v1666_v42  ;;  %v1380_v49 = vmax.f32 %v1327_v52, 0.0  ;;  %v1329_v46 = vadd.f32 %v1328_v4, %v2370_v26 }
 0x258   :  { %v1330_v33 = vpop.f32.mrf.mxu0 }
 0x259   :  { %v1667_v34 = vpack.c.bf16 %v1380_v49, %v1379_v48  ;;  %v1331_v53 = vadd.f32 %v1330_v33, %v2372_v27  ;;  %v1381_v29 = vmax.f32 %v1329_v46, 0.0 }
 0x25a   :  { %v1334_v57 = vpop.f32.mrf.mxu0 }
 0x25b   :  { %1499 = vst [vmem:[%s2459_s5 + $0x40] sm:$0xff] %v1667_v34  ;;  %v1382_v16 = vmax.f32 %v1331_v53, 0.0  ;;  %v1335_v47 = vadd.f32 %v1334_v57, %v2370_v26 }
 0x25c   :  { %v1336_v30 = vpop.f32.mrf.mxu0 }
 0x25d   :  { %v1668_v54 = vpack.c.bf16 %v1382_v16, %v1381_v29  ;;  %v1337_v56 = vadd.f32 %v1336_v30, %v2372_v27  ;;  %v1383_v40 = vmax.f32 %v1335_v47, 0.0 }
 0x25e   :  { %v1338_v58 = vpop.f32.mrf.mxu0 }
 0x25f   :  { %1500 = vst [vmem:[%s2459_s5 + $0x48] sm:$0xff] %v1668_v54  ;;  %v1384_v41 = vmax.f32 %v1337_v56, 0.0  ;;  %v1339_v59 = vadd.f32 %v1338_v58, %v2370_v26 }
 0x260   :  { %v1340_v60 = vpop.f32.mrf.mxu0 }
 0x261   :  { %v1669_v61 = vpack.c.bf16 %v1384_v41, %v1383_v40  ;;  %v1341_v62 = vadd.f32 %v1340_v60, %v2372_v27  ;;  %v1385_v0 = vmax.f32 %v1339_v59, 0.0 }
 0x262   :  { %v1344_v63 = vpop.f32.mrf.mxu0 }
 0x263   :  { %1501 = vst [vmem:[%s2459_s5 + $0x50] sm:$0xff] %v1669_v61  ;;  %v1386_v1 = vmax.f32 %v1341_v62, 0.0  ;;  %v1345_v2 = vadd.f32 %v1344_v63, %v2370_v26 }
 0x264   :  { %v1346_v55 = vpop.f32.mrf.mxu0 }
 0x265   :  { %v1670_v3 = vpack.c.bf16 %v1386_v1, %v1385_v0  ;;  %v1347_v5 = vadd.f32 %v1346_v55, %v2372_v27  ;;  %v1387_v7 = vmax.f32 %v1345_v2, 0.0 }
 0x266   :  { %v1348_v6 = vpop.f32.mrf.mxu0 }
 0x267   :  { %1502 = vst [vmem:[%s2459_s5 + $0x58] sm:$0xff] %v1670_v3  ;;  %v1388_v28 = vmax.f32 %v1347_v5, 0.0  ;;  %v1349_v37 = vadd.f32 %v1348_v6, %v2370_v26 }
 0x268   :  { %v1350_v8 = vpop.f32.mrf.mxu0 }
 0x269   :  { %v1671_v35 = vpack.c.bf16 %v1388_v28, %v1387_v7  ;;  %v1351_v36 = vadd.f32 %v1350_v8, %v2372_v27  ;;  %v1389_v10 = vmax.f32 %v1349_v37, 0.0 }
 0x26a   :  { %v1354_v50 = vpop.f32.mrf.mxu0 }
 0x26b   :  { %1503 = vst [vmem:[%s2459_s5 + $0x60] sm:$0xff] %v1671_v35  ;;  %v1390_v11 = vmax.f32 %v1351_v36, 0.0  ;;  %v1355_v44 = vadd.f32 %v1354_v50, %v2370_v26 }
 0x26c   :  { %v1356_v13 = vpop.f32.mrf.mxu0 }
 0x26d   :  { %v1672_v43 = vpack.c.bf16 %v1390_v11, %v1389_v10  ;;  %v1357_v45 = vadd.f32 %v1356_v13, %v2372_v27  ;;  %v1391_v51 = vmax.f32 %v1355_v44, 0.0 }
 0x26e   :  { %v1358_v15 = vpop.f32.mrf.mxu0 }
 0x26f   :  { %1504 = vst [vmem:[%s2459_s5 + $0x68] sm:$0xff] %v1672_v43  ;;  %v1392_v38 = vmax.f32 %v1357_v45, 0.0  ;;  %v1359_v14 = vadd.f32 %v1358_v15, %v2370_v26 }
 0x270   :  { %v1360_v22 = vpop.f32.mrf.mxu0 }
 0x271   :  { %v1673_v39 = vpack.c.bf16 %v1392_v38, %v1391_v51  ;;  %v1361_v17 = vadd.f32 %v1360_v22, %v2372_v27  ;;  %v1393_v18 = vmax.f32 %v1359_v14, 0.0 }
 0x273   :  { %1505 = vst [vmem:[%s2459_s5 + $0x70] sm:$0xff] %v1673_v39  ;;  %v1394_v19 = vmax.f32 %v1361_v17, 0.0 }
 0x275   :  { %v1674_v20 = vpack.c.bf16 %v1394_v19, %v1393_v18 }
 0x277   :  { %1506 = vst [vmem:[%s2459_s5 + $0x78] sm:$0xff] %v1674_v20 }
 0x278   :  { %1511 = vsyncpa [#allocation4], 1 }
 0x279   :  { %1512 = vsyncpa [#allocation6], 1 }
 0x27a   :  { %1513 = vsyncpa [#allocation9], 1 }

</bundles_post_ra>
